<compile_context>
chip_gen: v5e
topology: v5e:2x2
jax: 0.10.0
libtpu: 0.0.40
codegen_flags: <defaults>
</compile_context>

<pallas_src>
import functools
import itertools
from functools import reduce
from math import comb

import jax
import jax.numpy as jnp
from jax.experimental import pallas as pl
from jax.experimental.pallas import tpu as pltpu

# ----------------------------- problem config --------------------------------
N = 16          # number of graph nodes (must be a multiple of 8)
IN_DIM = 32     # input feature dim
OUT_DIM = 32    # output feature dim
ORDER = 2       # Volterra order
P = 3           # number of adjacency-matrix powers supplied
BATCH = 8       # number of graphs processed per call
B_TILE = 4      # graphs per grid step -> 2 "parallel" steps (keeps both v7x TCs busy)


# ------------------------------- Pallas kernel --------------------------------
def volterra_kernel(x_ref, a_ref, w_ref, b_ref, out_ref, *,
                    n_nodes, num_powers, order, in_dim, out_dim, b_tile):
    # x_ref:   [b_tile, N, in_dim]         original layout, no wrapper packing
    # a_ref:   [P*N, N]                    stacked adjacency powers
    # w_ref:   [order+1, in_dim, out_dim]  per-order projection weights (torch W.T)
    # b_ref:   [1, out_dim]                combination-count-folded biases
    # out_ref: [b_tile, N, out_dim]
    x_blk = x_ref[...]                                           # [b_tile, N, in_dim]

    # Lane-pack the tile's graphs so ALL P propagations for ALL graphs are one
    # zero-free MXU push:  A_flat [P*N, N] @ X_wide [N, b_tile*in_dim].
    x_graphs = [x_blk[b] for b in range(b_tile)]                 # each [N, in_dim]
    x_wide = jnp.concatenate(x_graphs, axis=1)                   # [N, b_tile*in_dim]
    m_all = jnp.dot(a_ref[...], x_wide,
                    preferred_element_type=jnp.float32)          # [P*N, b_tile*in_dim]
    # NOTE: K = N = 16 underfills the MXU depth; fine at this size, restructure
    # (e.g. pack powers along K) if N grows.

    # Repack each propagated feature graph-major onto sublanes
    # ([b_tile*N, in_dim]) so the projections below need no block-diagonal
    # zero-padded weights.  Static slices + concatenates only (XLU/copy work).
    def to_sublane(m):                                           # [N, b_tile*in_dim]
        return jnp.concatenate(
            [m[:, b * in_dim:(b + 1) * in_dim] for b in range(b_tile)], axis=0)

    ms = [to_sublane(m_all[p * n_nodes:(p + 1) * n_nodes, :])    # each [b_tile*N, in_dim]
          for p in range(num_powers)]

    # Power sums p_k = sum_p M_p**k (element-wise, VPU).
    pow_sums = []
    cur = ms
    for k in range(1, order + 1):
        if k > 1:
            cur = [c * m for c, m in zip(cur, ms)]
        pow_sums.append(reduce(lambda a, b: a + b, cur))

    # Complete homogeneous symmetric polynomials h_r via Newton recurrence ==
    # sum over all combinations-with-replacement products of order r.
    hs = []
    for r in range(1, order + 1):
        acc = pow_sums[r - 1]                                    # p_r * h_0
        for k in range(1, r):
            acc = acc + pow_sums[k - 1] * hs[r - k - 1]
        hs.append(acc * (1.0 / r))

    # Per-order accumulating projections: zero-free [b_tile*N, in_dim] @
    # [in_dim, out_dim] matmuls (M = b_tile*N rows), no concatenate copy.
    x_sub = jnp.concatenate(x_graphs, axis=0)                    # [b_tile*N, in_dim]
    feats = [x_sub] + hs
    out = jnp.dot(feats[0], w_ref[0], preferred_element_type=jnp.float32)
    for g in range(1, order + 1):
        out = out + jnp.dot(feats[g], w_ref[g], preferred_element_type=jnp.float32)
    out = jnp.maximum(out + b_ref[...], 0.0)                     # [b_tile*N, out_dim]

    # Store back in the module's natural [b, node, feature] layout.
    for b in range(b_tile):
        out_ref[b, :, :] = out[b * n_nodes:(b + 1) * n_nodes, :].astype(out_ref.dtype)


# ------------------------------- wrapper --------------------------------------
def volterra_graph_conv(X, A_stack, W_stack, b_stack, *, b_tile=B_TILE):
    """X: [B, N, IN_DIM], A_stack: [P, N, N],
    W_stack: [ORDER+1, IN_DIM, OUT_DIM] (torch W transposed),
    b_stack: [ORDER+1, 1, OUT_DIM]  ->  [B, N, OUT_DIM]."""
    B, n, in_dim = X.shape
    num_p = A_stack.shape[0]
    G, _, out_dim = W_stack.shape                 # G = order + 1
    order = G - 1
    assert B % b_tile == 0, "batch must be a multiple of the graph tile"
    assert n % 8 == 0, "N must be a multiple of 8 for (8,128) sublane tiling"
    num_tiles = B // b_tile                       # 2 parallel steps at BATCH=8

    # One-time constant prep (no per-call packing of X or unpacking of out).
    a_flat = A_stack.reshape(num_p * n, n)                                   # [P*N, N]
    counts = [1] + [comb(num_p + r - 1, r) for r in range(1, order + 1)]
    bias_total = sum(float(c) * b_stack[g] for g, c in enumerate(counts))    # [1, out_dim]

    kernel = functools.partial(
        volterra_kernel, n_nodes=n, num_powers=num_p, order=order,
        in_dim=in_dim, out_dim=out_dim, b_tile=b_tile)

    return pl.pallas_call(
        kernel,
        out_shape=jax.ShapeDtypeStruct((B, n, out_dim), jnp.float32),
        grid_spec=pltpu.PrefetchScalarGridSpec(
            num_scalar_prefetch=0,
            grid=(num_tiles,),
            in_specs=[
                pl.BlockSpec((b_tile, n, in_dim), lambda t: (t, 0, 0)),      # X tile
                pl.BlockSpec((num_p * n, n), lambda t: (0, 0)),              # A stack (const)
                pl.BlockSpec((G, in_dim, out_dim), lambda t: (0, 0, 0)),     # weights (const)
                pl.BlockSpec((1, out_dim), lambda t: (0, 0)),                # folded bias (const)
            ],
            out_specs=pl.BlockSpec((b_tile, n, out_dim), lambda t: (t, 0, 0)),
        ),
        compiler_params=pltpu.CompilerParams(dimension_semantics=("parallel",)),
    )(X, a_flat, W_stack, bias_total)


# ----------------------------- pure-JAX reference ------------------------------
def volterra_ref(X, A_stack, W_stack, b_stack):
    """Direct enumeration, mirroring the torch module for ONE graph."""
    mat_muls = [A_stack[p] @ X for p in range(A_stack.shape[0])]
    out = X @ W_stack[0] + b_stack[0]
    for r in range(1, ORDER + 1):
        for index_set in itertools.combinations_with_replacement(range(P), r):
            product = reduce(lambda a, b: a * b, [mat_muls[i] for i in index_set])
            out = out + product @ W_stack[r] + b_stack[r]
    return jnp.maximum(out, 0.0)


# ----------------------------------- main --------------------------------------
if __name__ == "__main__":
    key = jax.random.PRNGKey(0)
    k_x, k_a, k_w, k_b = jax.random.split(key, 4)

    # batch of node-feature matrices
    X = jax.random.normal(k_x, (BATCH, N, IN_DIM), dtype=jnp.float32)

    # adjacency matrix (row-normalized) and its powers A^1 .. A^P
    A = jax.random.uniform(k_a, (N, N), dtype=jnp.float32)
    A = A / jnp.sum(A, axis=-1, keepdims=True)
    A_powers = []
    Ap = A
    for _ in range(P):
        A_powers.append(Ap)
        Ap = Ap @ A
    A_stack = jnp.stack(A_powers, axis=0)  # [P, N, N]

    # torch Linear is y = x @ W.T + b; we store W.T stacked -> [ORDER+1, IN_DIM, OUT_DIM]
    W_stack = 0.05 * jax.random.normal(k_w, (ORDER + 1, IN_DIM, OUT_DIM), dtype=jnp.float32)
    b_stack = 0.05 * jax.random.normal(k_b, (ORDER + 1, 1, OUT_DIM), dtype=jnp.float32)

    out = volterra_graph_conv(X, A_stack, W_stack, b_stack)
    out = jax.block_until_ready(out)

    ref = jax.vmap(lambda x: volterra_ref(x, A_stack, W_stack, b_stack))(X)
    assert out.shape == (BATCH, N, OUT_DIM)
    max_err = float(jnp.max(jnp.abs(out - ref)))
    assert jnp.allclose(out, ref, atol=1e-4, rtol=1e-4), max_err

    print("KERNEL_OK")
</pallas_src>

<mosaic_0001>
module attributes {stable_mosaic.version = 11 : i64} {
  func.func @volterra_kernel(%arg0: i32, %arg1: memref<4x16x32xf32, #tpu.memory_space<vmem>>, %arg2: memref<48x16xf32, #tpu.memory_space<vmem>>, %arg3: memref<3x32x32xf32, #tpu.memory_space<vmem>>, %arg4: memref<1x32xf32, #tpu.memory_space<vmem>>, %arg5: memref<4x16x32xf32, #tpu.memory_space<vmem>>) attributes {dimension_semantics = [#tpu.dimension_semantics<parallel>], iteration_bounds = array<i64: 2>, scalar_prefetch = 0 : i64, scratch_operands = 0 : i64, tpu.core_type = #tpu.core_type<tc>, window_params = [{transform_indices = @transform_0, window_bounds = array<i64: 4, 16, 32>}, {pipeline_mode = #tpu.pipeline_mode<synchronous>, transform_indices = @transform_1, window_bounds = array<i64: 48, 16>}, {pipeline_mode = #tpu.pipeline_mode<synchronous>, transform_indices = @transform_2, window_bounds = array<i64: 3, 32, 32>}, {pipeline_mode = #tpu.pipeline_mode<synchronous>, transform_indices = @transform_3, window_bounds = array<i64: 1, 32>}, {transform_indices = @transform_4, window_bounds = array<i64: 4, 16, 32>}]} {
    %c0 = arith.constant 0 : index
    %c0_0 = arith.constant 0 : index
    %c0_1 = arith.constant 0 : index
    %0 = vector.load %arg1[%c0, %c0_0, %c0_1] : memref<4x16x32xf32, #tpu.memory_space<vmem>>, vector<4x16x32xf32>
    %1 = vector.extract_strided_slice %0 {offsets = [0, 0, 0], sizes = [1, 16, 32], strides = [1, 1, 1]} : vector<4x16x32xf32> to vector<1x16x32xf32>
    %2 = vector.shape_cast %1 : vector<1x16x32xf32> to vector<16x32xf32>
    %3 = vector.extract_strided_slice %0 {offsets = [1, 0, 0], sizes = [1, 16, 32], strides = [1, 1, 1]} : vector<4x16x32xf32> to vector<1x16x32xf32>
    %4 = vector.shape_cast %3 : vector<1x16x32xf32> to vector<16x32xf32>
    %5 = vector.extract_strided_slice %0 {offsets = [2, 0, 0], sizes = [1, 16, 32], strides = [1, 1, 1]} : vector<4x16x32xf32> to vector<1x16x32xf32>
    %6 = vector.shape_cast %5 : vector<1x16x32xf32> to vector<16x32xf32>
    %7 = vector.extract_strided_slice %0 {offsets = [3, 0, 0], sizes = [1, 16, 32], strides = [1, 1, 1]} : vector<4x16x32xf32> to vector<1x16x32xf32>
    %8 = vector.shape_cast %7 : vector<1x16x32xf32> to vector<16x32xf32>
    %9 = tpu.concatenate %2, %4, %6, %8 in 1 : vector<16x32xf32>, vector<16x32xf32>, vector<16x32xf32>, vector<16x32xf32> -> vector<16x128xf32>
    %c0_2 = arith.constant 0 : index
    %c0_3 = arith.constant 0 : index
    %10 = vector.load %arg2[%c0_2, %c0_3] : memref<48x16xf32, #tpu.memory_space<vmem>>, vector<48x16xf32>
    %cst = arith.constant dense<0.000000e+00> : vector<48x128xf32>
    %11 = tpu.matmul %10, %9, %cst {dimension_numbers = #tpu.dot_dimension_numbers<[1], [0], [0], [1], [0, 0, 1, 1], [], []>} : vector<48x16xf32>, vector<16x128xf32>, vector<48x128xf32> -> vector<48x128xf32>
    %12 = vector.extract_strided_slice %11 {offsets = [0, 0], sizes = [16, 128], strides = [1, 1]} : vector<48x128xf32> to vector<16x128xf32>
    %13 = vector.extract_strided_slice %12 {offsets = [0, 0], sizes = [16, 32], strides = [1, 1]} : vector<16x128xf32> to vector<16x32xf32>
    %14 = vector.extract_strided_slice %12 {offsets = [0, 32], sizes = [16, 32], strides = [1, 1]} : vector<16x128xf32> to vector<16x32xf32>
    %15 = vector.extract_strided_slice %12 {offsets = [0, 64], sizes = [16, 32], strides = [1, 1]} : vector<16x128xf32> to vector<16x32xf32>
    %16 = vector.extract_strided_slice %12 {offsets = [0, 96], sizes = [16, 32], strides = [1, 1]} : vector<16x128xf32> to vector<16x32xf32>
    %17 = tpu.concatenate %13, %14, %15, %16 in 0 : vector<16x32xf32>, vector<16x32xf32>, vector<16x32xf32>, vector<16x32xf32> -> vector<64x32xf32>
    %18 = vector.extract_strided_slice %11 {offsets = [16, 0], sizes = [16, 128], strides = [1, 1]} : vector<48x128xf32> to vector<16x128xf32>
    %19 = vector.extract_strided_slice %18 {offsets = [0, 0], sizes = [16, 32], strides = [1, 1]} : vector<16x128xf32> to vector<16x32xf32>
    %20 = vector.extract_strided_slice %18 {offsets = [0, 32], sizes = [16, 32], strides = [1, 1]} : vector<16x128xf32> to vector<16x32xf32>
    %21 = vector.extract_strided_slice %18 {offsets = [0, 64], sizes = [16, 32], strides = [1, 1]} : vector<16x128xf32> to vector<16x32xf32>
    %22 = vector.extract_strided_slice %18 {offsets = [0, 96], sizes = [16, 32], strides = [1, 1]} : vector<16x128xf32> to vector<16x32xf32>
    %23 = tpu.concatenate %19, %20, %21, %22 in 0 : vector<16x32xf32>, vector<16x32xf32>, vector<16x32xf32>, vector<16x32xf32> -> vector<64x32xf32>
    %24 = vector.extract_strided_slice %11 {offsets = [32, 0], sizes = [16, 128], strides = [1, 1]} : vector<48x128xf32> to vector<16x128xf32>
    %25 = vector.extract_strided_slice %24 {offsets = [0, 0], sizes = [16, 32], strides = [1, 1]} : vector<16x128xf32> to vector<16x32xf32>
    %26 = vector.extract_strided_slice %24 {offsets = [0, 32], sizes = [16, 32], strides = [1, 1]} : vector<16x128xf32> to vector<16x32xf32>
    %27 = vector.extract_strided_slice %24 {offsets = [0, 64], sizes = [16, 32], strides = [1, 1]} : vector<16x128xf32> to vector<16x32xf32>
    %28 = vector.extract_strided_slice %24 {offsets = [0, 96], sizes = [16, 32], strides = [1, 1]} : vector<16x128xf32> to vector<16x32xf32>
    %29 = tpu.concatenate %25, %26, %27, %28 in 0 : vector<16x32xf32>, vector<16x32xf32>, vector<16x32xf32>, vector<16x32xf32> -> vector<64x32xf32>
    %30 = arith.addf %17, %23 : vector<64x32xf32>
    %31 = arith.addf %30, %29 : vector<64x32xf32>
    %32 = arith.mulf %17, %17 : vector<64x32xf32>
    %33 = arith.mulf %23, %23 : vector<64x32xf32>
    %34 = arith.mulf %29, %29 : vector<64x32xf32>
    %35 = arith.addf %32, %33 : vector<64x32xf32>
    %36 = arith.addf %35, %34 : vector<64x32xf32>
    %cst_4 = arith.constant 1.000000e+00 : f32
    %37 = vector.broadcast %cst_4 : f32 to vector<64x32xf32>
    %38 = arith.mulf %31, %37 : vector<64x32xf32>
    %39 = arith.mulf %31, %38 : vector<64x32xf32>
    %40 = arith.addf %36, %39 : vector<64x32xf32>
    %cst_5 = arith.constant 5.000000e-01 : f32
    %41 = vector.broadcast %cst_5 : f32 to vector<64x32xf32>
    %42 = arith.mulf %40, %41 : vector<64x32xf32>
    %43 = tpu.concatenate %2, %4, %6, %8 in 0 : vector<16x32xf32>, vector<16x32xf32>, vector<16x32xf32>, vector<16x32xf32> -> vector<64x32xf32>
    %c0_6 = arith.constant 0 : index
    %c0_7 = arith.constant 0 : index
    %c0_8 = arith.constant 0 : index
    %44 = vector.load %arg3[%c0_6, %c0_7, %c0_8] : memref<3x32x32xf32, #tpu.memory_space<vmem>>, vector<1x32x32xf32>
    %45 = vector.shape_cast %44 : vector<1x32x32xf32> to vector<32x32xf32>
    %cst_9 = arith.constant dense<0.000000e+00> : vector<64x32xf32>
    %46 = tpu.matmul %43, %45, %cst_9 {dimension_numbers = #tpu.dot_dimension_numbers<[1], [0], [0], [1], [0, 0, 1, 1], [], []>} : vector<64x32xf32>, vector<32x32xf32>, vector<64x32xf32> -> vector<64x32xf32>
    %c1 = arith.constant 1 : index
    %c0_10 = arith.constant 0 : index
    %c0_11 = arith.constant 0 : index
    %47 = vector.load %arg3[%c1, %c0_10, %c0_11] : memref<3x32x32xf32, #tpu.memory_space<vmem>>, vector<1x32x32xf32>
    %48 = vector.shape_cast %47 : vector<1x32x32xf32> to vector<32x32xf32>
    %cst_12 = arith.constant dense<0.000000e+00> : vector<64x32xf32>
    %49 = tpu.matmul %38, %48, %cst_12 {dimension_numbers = #tpu.dot_dimension_numbers<[1], [0], [0], [1], [0, 0, 1, 1], [], []>} : vector<64x32xf32>, vector<32x32xf32>, vector<64x32xf32> -> vector<64x32xf32>
    %50 = arith.addf %46, %49 : vector<64x32xf32>
    %c2 = arith.constant 2 : index
    %c0_13 = arith.constant 0 : index
    %c0_14 = arith.constant 0 : index
    %51 = vector.load %arg3[%c2, %c0_13, %c0_14] : memref<3x32x32xf32, #tpu.memory_space<vmem>>, vector<1x32x32xf32>
    %52 = vector.shape_cast %51 : vector<1x32x32xf32> to vector<32x32xf32>
    %cst_15 = arith.constant dense<0.000000e+00> : vector<64x32xf32>
    %53 = tpu.matmul %42, %52, %cst_15 {dimension_numbers = #tpu.dot_dimension_numbers<[1], [0], [0], [1], [0, 0, 1, 1], [], []>} : vector<64x32xf32>, vector<32x32xf32>, vector<64x32xf32> -> vector<64x32xf32>
    %54 = arith.addf %50, %53 : vector<64x32xf32>
    %c0_16 = arith.constant 0 : index
    %c0_17 = arith.constant 0 : index
    %55 = vector.load %arg4[%c0_16, %c0_17] : memref<1x32xf32, #tpu.memory_space<vmem>>, vector<1x32xf32>
    %56 = vector.broadcast %55 : vector<1x32xf32> to vector<64x32xf32>
    %57 = arith.addf %54, %56 : vector<64x32xf32>
    %cst_18 = arith.constant 0.000000e+00 : f32
    %58 = vector.broadcast %cst_18 : f32 to vector<64x32xf32>
    %59 = arith.maximumf %57, %58 : vector<64x32xf32>
    %60 = vector.extract_strided_slice %59 {offsets = [0, 0], sizes = [16, 32], strides = [1, 1]} : vector<64x32xf32> to vector<16x32xf32>
    %c0_19 = arith.constant 0 : index
    %c0_20 = arith.constant 0 : index
    %c0_21 = arith.constant 0 : index
    %61 = vector.load %arg5[%c0_19, %c0_20, %c0_21] : memref<4x16x32xf32, #tpu.memory_space<vmem>>, vector<1x16x32xf32>
    %62 = vector.shape_cast %61 : vector<1x16x32xf32> to vector<16x32xf32>
    %63 = vector.shape_cast %60 : vector<16x32xf32> to vector<1x16x32xf32>
    tpu.vector_store %arg5[%c0_19, %c0_20, %c0_21], %63 {strides = array<i32>} : memref<4x16x32xf32, #tpu.memory_space<vmem>>, vector<1x16x32xf32>,
    %64 = vector.extract_strided_slice %59 {offsets = [16, 0], sizes = [16, 32], strides = [1, 1]} : vector<64x32xf32> to vector<16x32xf32>
    %c1_22 = arith.constant 1 : index
    %c0_23 = arith.constant 0 : index
    %c0_24 = arith.constant 0 : index
    %65 = vector.load %arg5[%c1_22, %c0_23, %c0_24] : memref<4x16x32xf32, #tpu.memory_space<vmem>>, vector<1x16x32xf32>
    %66 = vector.shape_cast %65 : vector<1x16x32xf32> to vector<16x32xf32>
    %67 = vector.shape_cast %64 : vector<16x32xf32> to vector<1x16x32xf32>
    tpu.vector_store %arg5[%c1_22, %c0_23, %c0_24], %67 {strides = array<i32>} : memref<4x16x32xf32, #tpu.memory_space<vmem>>, vector<1x16x32xf32>,
    %68 = vector.extract_strided_slice %59 {offsets = [32, 0], sizes = [16, 32], strides = [1, 1]} : vector<64x32xf32> to vector<16x32xf32>
    %c2_25 = arith.constant 2 : index
    %c0_26 = arith.constant 0 : index
    %c0_27 = arith.constant 0 : index
    %69 = vector.load %arg5[%c2_25, %c0_26, %c0_27] : memref<4x16x32xf32, #tpu.memory_space<vmem>>, vector<1x16x32xf32>
    %70 = vector.shape_cast %69 : vector<1x16x32xf32> to vector<16x32xf32>
    %71 = vector.shape_cast %68 : vector<16x32xf32> to vector<1x16x32xf32>
    tpu.vector_store %arg5[%c2_25, %c0_26, %c0_27], %71 {strides = array<i32>} : memref<4x16x32xf32, #tpu.memory_space<vmem>>, vector<1x16x32xf32>,
    %72 = vector.extract_strided_slice %59 {offsets = [48, 0], sizes = [16, 32], strides = [1, 1]} : vector<64x32xf32> to vector<16x32xf32>
    %c3 = arith.constant 3 : index
    %c0_28 = arith.constant 0 : index
    %c0_29 = arith.constant 0 : index
    %73 = vector.load %arg5[%c3, %c0_28, %c0_29] : memref<4x16x32xf32, #tpu.memory_space<vmem>>, vector<1x16x32xf32>
    %74 = vector.shape_cast %73 : vector<1x16x32xf32> to vector<16x32xf32>
    %75 = vector.shape_cast %72 : vector<16x32xf32> to vector<1x16x32xf32>
    tpu.vector_store %arg5[%c3, %c0_28, %c0_29], %75 {strides = array<i32>} : memref<4x16x32xf32, #tpu.memory_space<vmem>>, vector<1x16x32xf32>,
    return
  }
  func.func @transform_0(%arg0: i32) -> (i32, i32, i32) {
    %c0_i32 = arith.constant 0 : i32
    %c0_i32_0 = arith.constant 0 : i32
    %c0_i32_1 = arith.constant 0 : i32
    return %arg0, %c0_i32, %c0_i32_0 : i32, i32, i32
  }
  func.func @transform_1(%arg0: i32) -> (i32, i32) {
    %c0_i32 = arith.constant 0 : i32
    %c0_i32_0 = arith.constant 0 : i32
    %c0_i32_1 = arith.constant 0 : i32
    return %c0_i32, %c0_i32_0 : i32, i32
  }
  func.func @transform_2(%arg0: i32) -> (i32, i32, i32) {
    %c0_i32 = arith.constant 0 : i32
    %c0_i32_0 = arith.constant 0 : i32
    %c0_i32_1 = arith.constant 0 : i32
    %c0_i32_2 = arith.constant 0 : i32
    return %c0_i32, %c0_i32_0, %c0_i32_1 : i32, i32, i32
  }
  func.func @transform_3(%arg0: i32) -> (i32, i32) {
    %c0_i32 = arith.constant 0 : i32
    %c0_i32_0 = arith.constant 0 : i32
    %c0_i32_1 = arith.constant 0 : i32
    return %c0_i32, %c0_i32_0 : i32, i32
  }
  func.func @transform_4(%arg0: i32) -> (i32, i32, i32) {
    %c0_i32 = arith.constant 0 : i32
    %c0_i32_0 = arith.constant 0 : i32
    %c0_i32_1 = arith.constant 0 : i32
    return %arg0, %c0_i32, %c0_i32_0 : i32, i32, i32
  }
}

</mosaic_0001>

<bundles_post_ra>
// kernel: tpu_custom_call.1
= control target key start
LH: loop header
LB: loop body
LE: loop exit
PB: predicated region body
PF: predicated region fallthrough
CT: control target
= control target key end

     0   :  { %9 = vsyncpa [#allocation3], 0  ;;  %s1393_s0 = inlined_call_operand.hbm [shape: f32[8,16,32], index: 0, kind: input, shape index: {}]   ;;  %s1394_s1 = inlined_call_operand.vmem [shape: f32[48,16], index: 1, kind: input, shape index: {}]   ;;  %s1395_s2 = inlined_call_operand.hbm [shape: f32[3,32,32], index: 2, kind: input, shape index: {}]   ;;  %s1396_s3 = inlined_call_operand.vmem [shape: f32[1,32], index: 3, kind: input, shape index: {}]   ;;  %s1397_s4 = inlined_call_operand.hbm [shape: f32[8,16,32], index: 4, kind: output, shape index: {}]  }
   0x1   :  { %11 = vsyncpa [#allocation3 + $0x1], 0 }
   0x2   :  { %12 = vsyncpa [#allocation6], 0 }
   0x3   :  { %13 = vsyncpa [#allocation4], 0 }
   0x4   :  { %15 = vsyncpa [#allocation4 + $0x1], 0  ;;  %s1124_s15 = smov 0   ;;  %s1126_s16 = smov 0  }
   0x5   :  { %s1128_s17 = smov 0   ;;  %s1130_s18 = smov 0  }
   0x6 LB: > { %s1145_s19 = sadd.s32 4294967295, %s1089_s18   ;;  %s821_s20 = sadd.s32 4294967294, %s1089_s18   ;;  %s1089_s18 = sphi %s1130_s18, %s1407_s18   ;;  %s1085_s17 = sphi %s1128_s17, %s1406_s17   ;;  %s1081_s16 = sphi %s1126_s16, %s1405_s16   ;;  %s1077_s15 = sphi %s1124_s15, %s1404_s15  }
   0x7   : > { %p41_p0 = scmp.ne.s32.totalorder %s1081_s16, %s1077_s15  ;;  %p42_p1 = scmp.eq.s32.totalorder %s1145_s19, 0 }
   0x8   : > { %p128_p2 = scmp.eq.s32.totalorder %s1145_s19, 1  ;;  %p134_p3 = scmp.eq.s32.totalorder %s821_s20, 1 }
   0x9   : > { %p1154_p4 = por %p42_p1, %p41_p0  ;;  %p822_p5 = scmp.ge.s32.totalorder %s1089_s18, 1 }
   0xa   : > { %p1159_p6 = por %p134_p3, %p41_p0  ;;  %p141_p7 = scmp.lt.s32.totalorder %s1089_s18, 3 }
   0xb   : > { %s155_s25 = sshll.u32 %s1395_s2, 4  ;;  %s1091_s27 = smov [#allocation5]   ;;  %s156_s25 = int_to_ptr.hbm [resolvable:$true] %s155_s25 }
   0xc   : > { %p1167_p8 = pnand %p822_p5, %p141_p7  ;;  %s157_s28 = sshll.u32 %s1091_s27, 4  ;;  %s158_s28 = int_to_ptr.vmem [resolvable:$true] %s157_s28 }
   0xd   : > { %s1177_s29 = sadd.s32 1, %s1089_s18   ;;  %s1092_s30 = smov 128  }
   0xe   : > { %p887_p9 = pneg %p1167_p8  ;;  %s1093_s5 = smov 8  }
   0xf   : > { %s25_s6 = ssub.s32 %s1089_s18, %s1177_s29  ;;  %s28_s7 = sadd.s32 1, %s1085_s17 }
  0x10   : > { %p888_p10 = pnand %p887_p9, %p42_p1  ;;  %p26_p12 = scmp.eq.s32.totalorder %s25_s6, 0 }
  0x11   : > { %p35_p13 = scmp.ne.s32.totalorder %s1085_s17, %s1081_s16  ;;  %p36_p0 = scmp.eq.s32.totalorder %s1089_s18, 0 }
  0x12   : > { %890 = dma.hbm_to_vmem [thread:$0]  (!%p888_p10), %s156_s25, 1536, %s158_s28, [#allocation6], %s1092_s30, %s1092_s30, %s1093_s5  }
  0x13   : > { %s1189_s8 = scalar_select %p26_p12, %s1085_s17, %s28_s7  }
  0x14   : > { %p1193_p3 = por %p128_p2, %p35_p13  ;;  %p900_p5 = scmp.lt.s32.totalorder %s1089_s18, 2 }
  0x15   : > { %s174_s10 = sand.u32 1, %s1085_s17   ;;  %s876_s11 = sshll.u32 %s1089_s18, 6 }
  0x16   : > { %p37_p7 = por %p36_p0, %p35_p13  ;;  %s825_s12 = sshll.u32 %s174_s10, 6 }
  0x17   : > { %s184_s20 = scalar_lea.hbm %s1393_s0, %s876_s11  ;;  %s178_s24 = scalar_lea.vmem [#allocation2], %s825_s12 }
  0x18   : > { %s185_s23 = sshll.u32 %s184_s20, 4  ;;  %s187_s25 = sshll.u32 %s178_s24, 4  ;;  %s186_s23 = int_to_ptr.hbm [resolvable:$true] %s185_s23  ;;  %s188_s25 = int_to_ptr.vmem [resolvable:$true] %s187_s25 }
  0x19   : > { %p1203_p9 = pnand %p900_p5, %p37_p7  ;;  %s175_s28 = scalar_lea.sflag [#allocation3], %s174_s10 }
  0x1a   : > { %s989_s6 = sshra.s32 %s186_s23, 4  ;;  %s996_s12 = scalar_lea.hbm %s1393_s0, 128  ;;  %s990_s6 = int_to_ptr.hbm [resolvable:$true] %s989_s6 }
  0x1b   : > { %s991_s7 = scalar_lea.hbm %s990_s6, 64  ;;  %p993_p10 = pneg %p1203_p9 }
  0x1c   : > { %p992_p2 = scmp.ne.s32.totalorder %s990_s6, %s991_s7  ;;  %p997_p0 = scmp.lt.s32.totalorder %s990_s6, %s1393_s0 }
  0x1d   : > { %p998_p5 = scmp.lt.s32.totalorder %s996_s12, %s991_s7 }
  0x1e   : > { %p994_p12 = pnand %p993_p10, %p992_p2 }
  0x1f   : > { %p999_p7 = por %p998_p5, %p997_p0 }
  0x20   : > { %p995_p13 = pneg %p994_p12 }
  0x22   : > { %p1000_p11 = pnand %p999_p7, %p995_p13 }
  0x24   : > { %1003 = shalt.err (!%p1000_p11)
}
  0x25   : > { %894 = dma.hbm_to_vmem [thread:$0]  (!%p1203_p9), %s186_s23, 1024, %s188_s25, %s175_s28, %s1092_s30, %s1092_s30, %s1093_s5  }
  0x26   : > { %199 = sbr.rel (%p1167_p8) target bundleno = 628 (0x274), region = 36  ;;  %s1223_s10 = sand.u32 (!%p1167_p8), 1, %s1081_s16  }
  0x27   : > { %s830_s24 = sshll.u32 (!%p1167_p8), %s1223_s10, 6  ;;  %s202_s6 = scalar_lea.sflag (!%p1167_p8), [#allocation3], %s1223_s10 }
  0x28   : > { %s205_s7 = scalar_lea.vmem (!%p1167_p8), [#allocation2], %s830_s24 }
  0x2b   : > { %1064 = dma.done.wait (%p1154_p4), %s202_s6, 1024  }
  0x2c   : > { %1066 = vsyncadd (%p1154_p4), %s202_s6, 4294966272 }
  0x2d   : > { %1068 = dma.done.wait (%p42_p1), [#allocation6], 1536  }
  0x2e   : > { %1070 = vsyncadd (%p42_p1), [#allocation6], 4294965760  ;;  %v1237_v0 = vld [vmem:[%s205_s7 + $0x10] sm:$0xff]  ;;  %v1239_v1 = vld [vmem:[%s205_s7 + $0x18] sm:$0xff]  ;;  %s1094_s21 = smov 32   ;;  %s1095_s26 = smov 96  }
  0x2f   : > { %v943_v2 = vpack.i.bf16 %v1237_v0, %v1239_v1  ;;  %v1243_v3 = vld [vmem:[%s205_s7 + $0x30] sm:$0xff]  ;;  %v1245_v4 = vld [vmem:[%s205_s7 + $0x38] sm:$0xff]  ;;  %v1250_v6 = vld [vmem:[%s205_s7 + $0x20] sm:$0xff]  ;;  %s1096_s30 = smov 64   ;;  %vm270_vm0 = vcmask 261120   ;;  %vm273_vm1 = vcmask 523264  }
  0x30   : > { %v953_v5 = vpack.i.bf16 %v1243_v3, %v1245_v4  ;;  %v1252_v7 = vld [vmem:[%s205_s7 + $0x28] sm:$0xff]  ;;  %v238_v14 = vld [vmem:[%s205_s7] sm:$0xff]  ;;  %vm276_vm2 = vcmask 785408   ;;  %vm285_vm3 = vcmask 130048   ;;  %v281_v28 = vld [vmem:[%s1394_s1 + $0x10] sm:$0xff]  ;;  %s1039_s20 = scalar_lea.hbm %s1397_s4, 128 }
  0x31   : > { %944 = vrot.lane.b32.xlu0 %v943_v2, %s1094_s21  ;;  %v948_v8 = vpack.i.bf16 %v1250_v6, %v1252_v7  ;;  %v239_v13 = vld [vmem:[%s205_s7 + $0x8] sm:$0xff]  ;;  %v279_v25 = vld [vmem:[%s1394_s1] sm:$0xff]  ;;  %v282_v29 = vld [vmem:[%s1394_s1 + $0x18] sm:$0xff] }
  0x32   : > { %954 = vrot.lane.b32.xlu1 %v953_v5, %s1095_s26  ;;  %v280_v27 = vld [vmem:[%s1394_s1 + $0x8] sm:$0xff]  ;;  %v283_v30 = vld [vmem:[%s1394_s1 + $0x20] sm:$0xff]  ;;  %v482_v32 = vld [vmem:[#allocation5 + $0x18] sm:$0xff] }
  0x33   : > { %v284_v31 = vld [vmem:[%s1394_s1 + $0x28] sm:$0xff]  ;;  %583 = vmatpush.msra.mxu2 %v482_v32  ;;  %v481_v33 = vld [vmem:[#allocation5 + $0x10] sm:$0xff]  ;;  %v487_v35 = vld [vmem:[#allocation5 + $0x38] sm:$0xff] }
  0x34   : > { %v480_v34 = vld [vmem:[#allocation5 + $0x8] sm:$0xff]  ;;  %v479_v36 = vld [vmem:[#allocation5] sm:$0xff]  ;;  %524 = vmatpush.msra.mxu1 %v487_v35  ;;  %v486_v37 = vld [vmem:[#allocation5 + $0x30] sm:$0xff] }
  0x35   : > { %584 = vmatpush.msra.mxu2 %v481_v33  ;;  %v485_v38 = vld [vmem:[#allocation5 + $0x28] sm:$0xff]  ;;  %v484_v40 = vld [vmem:[#allocation5 + $0x20] sm:$0xff]  ;;  %v616_v41 = vld [vmem:[#allocation5 + $0x58] sm:$0xff] }
  0x36   : > { %525 = vmatpush.msra.mxu1 %v486_v37  ;;  %653 = vmatpush.msra.mxu3 %v616_v41  ;;  %v615_v42 = vld [vmem:[#allocation5 + $0x50] sm:$0xff]  ;;  %v614_v43 = vld [vmem:[#allocation5 + $0x48] sm:$0xff]  ;;  %v613_v45 = vld [vmem:[#allocation5 + $0x40] sm:$0xff] }
  0x37   : > { %585 = vmatpush.msra.mxu2 %v480_v34 }
  0x38   : > { %526 = vmatpush.msra.mxu1 %v485_v38  ;;  %654 = vmatpush.msra.mxu3 %v615_v42 }
  0x39   : > { %949 = vrot.lane.b32.xlu0 %v948_v8, %s1096_s30  ;;  %586 = vmatpush.msra.mxu2 %v479_v36 }
  0x3a   : > { %847 = vmatmul.msk.f32.vlgmr.msra.gmra.mxu2 %vm270_vm0, %v238_v14  ;;  %527 = vmatpush.msra.mxu1 %v484_v40 }
  0x3b   : > { %655 = vmatpush.msra.mxu3 %v614_v43 }
  0x3d   : > { %656 = vmatpush.msra.mxu3 %v613_v45 }
  0x42   : > { %848 = vmatmul.msk.f32.gmra.mxu2 %vm270_vm0, %v239_v13 }
  0x4a   : > { %849 = vmatmul.msk.f32.gmra.mxu2 %vm270_vm0, %v1237_v0 }
  0x52   : > { %850 = vmatmul.msk.f32.gmra.mxu2 %vm270_vm0, %v1239_v1 }
  0x5a   : > { %851 = vmatmul.msk.f32.gmra.mxu2 %vm270_vm0, %v1250_v6 }
  0x62   : > { %852 = vmatmul.msk.f32.gmra.mxu2 %vm270_vm0, %v1252_v7 }
  0x6a   : > { %853 = vmatmul.msk.f32.gmra.mxu2 %vm270_vm0, %v1243_v3 }
  0x72   : > { %854 = vmatmul.msk.f32.gmra.mxu2 %vm270_vm0, %v1245_v4 }
  0xa3   : > { %v945_v9 = vpop.permute.xlu0 %944 }
  0xa4   : > { %v955_v10 = vpop.permute.xlu1 %954  ;;  %v947_v11 = vunpack.i.h.bf16 %v945_v9  ;;  %v946_v12 = vunpack.i.l.bf16 %v945_v9 }
  0xa5   : > { %v956_v16 = vunpack.i.l.bf16 %v955_v10  ;;  %v957_v19 = vunpack.i.h.bf16 %v955_v10 }
  0xa6   : > { %v272_v20 = vsel %vm270_vm0, %v239_v13, %v946_v12  ;;  %v271_v21 = vsel %vm270_vm0, %v238_v14, %v947_v11 }
  0xab   : > { %v950_v15 = vpop.permute.xlu0 %949 }
  0xac   : > { %v952_v17 = vunpack.i.h.bf16 %v950_v15  ;;  %v951_v18 = vunpack.i.l.bf16 %v950_v15 }
  0xae   : > { %v275_v22 = vsel %vm273_vm1, %v272_v20, %v951_v18  ;;  %v274_v23 = vsel %vm273_vm1, %v271_v21, %v952_v17 }
  0xaf   : > { %v278_v24 = vsel %vm276_vm2, %v275_v22, %v956_v16  ;;  %v277_v26 = vsel %vm276_vm2, %v274_v23, %v957_v19 }
  0xb0   : > { %318 = vmatpush.msra.mxu0 %v278_v24 }
  0xb2   : > { %319 = vmatpush.msra.mxu0 %v277_v26 }
  0xb3   : > { %833 = vmatmul.msk.f32.vlgmr.msra.gmra.mxu0 %vm285_vm3, %v279_v25 }
  0xbb   : > { %834 = vmatmul.msk.f32.gmra.mxu0 %vm285_vm3, %v280_v27 }
  0xc3   : > { %835 = vmatmul.msk.f32.gmra.mxu0 %vm285_vm3, %v281_v28 }
  0xcb   : > { %836 = vmatmul.msk.f32.gmra.mxu0 %vm285_vm3, %v282_v29 }
  0xd3   : > { %837 = vmatmul.msk.f32.gmra.mxu0 %vm285_vm3, %v283_v30 }
  0xdb   : > { %838 = vmatmul.msk.f32.gmra.mxu0 %vm285_vm3, %v284_v31 }
 0x130   : > { %v321_v39 = vpop.f32.mrf.mxu0 }
 0x131   : > { %341 = vrot.lane.b32.xlu1 %v321_v39, %s1095_s26  ;;  %v415_v49 = vmul.f32 %v321_v39, %v321_v39 }
 0x138   : > { %v324_v44 = vpop.f32.mrf.mxu0 }
 0x139   : > { %343 = vrot.lane.b32.xlu0 %v324_v44, %s1095_s26  ;;  %v416_v59 = vmul.f32 %v324_v44, %v324_v44 }
 0x140   : > { %v327_v46 = vpop.f32.mrf.mxu0 }
 0x141   : > { %347 = vrot.lane.b32.xlu0 %v321_v39, %s1096_s30  ;;  %361 = vrot.lane.b32.xlu2 %v327_v46, %s1095_s26  ;;  %v423_v48 = vmul.f32 %v327_v46, %v327_v46  ;;  %v399_v50 = vadd.f32 %v327_v46, %v321_v39 }
 0x143   : > { %v439_v54 = vadd.f32 %v423_v48, %v415_v49 }
 0x148   : > { %v330_v47 = vpop.f32.mrf.mxu0 }
 0x149   : > { %349 = vrot.lane.b32.xlu0 %v324_v44, %s1096_s30  ;;  %363 = vrot.lane.b32.xlu1 %v330_v47, %s1095_s26  ;;  %v424_v57 = vmul.f32 %v330_v47, %v330_v47  ;;  %v400_v61 = vadd.f32 %v330_v47, %v324_v44 }
 0x14b   : > { %v440_v1 = vadd.f32 %v424_v57, %v416_v59 }
 0x150   : > { %v333_v51 = vpop.f32.mrf.mxu0 }
 0x151   : > { %353 = vrot.lane.b32.xlu0 %v321_v39, %s1094_s21  ;;  %367 = vrot.lane.b32.xlu1 %v327_v46, %s1096_s30  ;;  %v407_v52 = vadd.f32 %v399_v50, %v333_v51  ;;  %v431_v53 = vmul.f32 %v333_v51, %v333_v51 }
 0x152   : > { %381 = vrot.lane.b32.xlu2 %v333_v51, %s1095_s26 }
 0x153   : > { %v455_v55 = vmul.f32 %v407_v52, %v407_v52  ;;  %839 = vmatmul.msk.f32.vlgmr.msra.gmra.mxu1 %vm270_vm0, %v407_v52  ;;  %v447_v56 = vadd.f32 %v439_v54, %v431_v53 }
 0x155   : > { %v463_v58 = vadd.f32 %v455_v55, %v447_v56 }
 0x157   : > { %v471_v60 = vmul.f32 0.5, %v463_v58 }
 0x158   : > { %v336_v62 = vpop.f32.mrf.mxu0 }
 0x159   : > { %v432_v63 = vmul.f32 %v336_v62, %v336_v62  ;;  %355 = vrot.lane.b32.xlu0 %v324_v44, %s1094_s21  ;;  %369 = vrot.lane.b32.xlu1 %v330_v47, %s1096_s30  ;;  %v408_v0 = vadd.f32 %v400_v61, %v336_v62 }
 0x15a   : > { %855 = vmatmul.msk.f32.vlgmr.msra.gmra.mxu3 %vm270_vm0, %v471_v60  ;;  %383 = vrot.lane.b32.xlu2 %v336_v62, %s1095_s26 }
 0x15b   : > { %v456_v2 = vmul.f32 %v408_v0, %v408_v0  ;;  %840 = vmatmul.msk.f32.gmra.mxu1 %vm270_vm0, %v408_v0  ;;  %v448_v5 = vadd.f32 %v440_v1, %v432_v63 }
 0x15d   : > { %v464_v6 = vadd.f32 %v456_v2, %v448_v5 }
 0x15f   : > { %v472_v7 = vmul.f32 0.5, %v464_v6  ;;  %v588_v6 = vpop.f32.mrf.mxu2 }
 0x161   : > { %373 = vrot.lane.b32.xlu1 %v327_v46, %s1094_s21 }
 0x162   : > { %387 = vrot.lane.b32.xlu2 %v333_v51, %s1096_s30  ;;  %856 = vmatmul.msk.f32.gmra.mxu3 %vm270_vm0, %v472_v7 }
 0x169   : > { %375 = vrot.lane.b32.xlu1 %v330_v47, %s1094_s21 }
 0x16a   : > { %389 = vrot.lane.b32.xlu2 %v336_v62, %s1096_s30  ;;  %s1333_s30 = scalar_lea.vmem [#allocation7], %s830_s24  ;;  %s878_s24 = sshll.u32 %s1145_s19, 6 }
 0x16b   : > { %s734_s25 = scalar_lea.hbm %s1397_s4, %s878_s24  ;;  %s735_s27 = sshll.u32 %s1333_s30, 4  ;;  %s736_s27 = int_to_ptr.vmem [resolvable:$true] %s735_s27 }
 0x16c   : > { %s737_s28 = sshll.u32 %s734_s25, 4  ;;  %s722_s19 = scalar_lea.sflag [#allocation4], %s1223_s10  ;;  %s738_s28 = int_to_ptr.hbm [resolvable:$true] %s737_s28 }
 0x16d   : > { %s1033_s11 = sshra.s32 %s738_s28, 4  ;;  %s1034_s11 = int_to_ptr.hbm [resolvable:$true] %s1033_s11 }
 0x16e   : > { %s1035_s13 = scalar_lea.hbm %s1034_s11, 64  ;;  %p1040_p11 = scmp.lt.s32.totalorder %s1034_s11, %s1397_s4 }
 0x16f   : > { %p1036_p1 = scmp.ne.s32.totalorder %s1034_s11, %s1035_s13  ;;  %p1041_p9 = scmp.lt.s32.totalorder %s1039_s20, %s1035_s13 }
 0x171   : > { %p1037_p4 = pnand %p1036_p1, %p1193_p3  ;;  %p1042_p2 = por %p1041_p9, %p1040_p11 }
 0x172   : > { %393 = vrot.lane.b32.xlu2 %v333_v51, %s1094_s21 }
 0x173   : > { %p1038_p8 = pneg %p1037_p4 }
 0x175   : > { %p1043_p10 = pnand %p1042_p2, %p1038_p8 }
 0x17a   : > { %395 = vrot.lane.b32.xlu2 %v336_v62, %s1094_s21 }
 0x19b   : > { %v362_v8 = vpop.permute.xlu2 %361 }
 0x19c   : > { %v425_v10 = vmul.f32 %v362_v8, %v362_v8 }
 0x1a3   : > { %v342_v3 = vpop.permute.xlu1 %341 }
 0x1a4   : > { %v417_v9 = vmul.f32 %v342_v3, %v342_v3  ;;  %v401_v11 = vadd.f32 %v362_v8, %v342_v3 }
 0x1a6   : > { %v441_v13 = vadd.f32 %v425_v10, %v417_v9 }
 0x1ab   : > { %v344_v4 = vpop.permute.xlu0 %343 }
 0x1ac   : > { %v382_v12 = vpop.permute.xlu2 %381  ;;  %v418_v23 = vmul.f32 %v344_v4, %v344_v4 }
 0x1ad   : > { %v409_v14 = vadd.f32 %v401_v11, %v382_v12  ;;  %v433_v15 = vmul.f32 %v382_v12, %v382_v12 }
 0x1af   : > { %v449_v16 = vadd.f32 %v441_v13, %v433_v15  ;;  %v457_v17 = vmul.f32 %v409_v14, %v409_v14  ;;  %841 = vmatmul.msk.f32.gmra.mxu1 %vm270_vm0, %v409_v14 }
 0x1b1   : > { %v465_v18 = vadd.f32 %v457_v17, %v449_v16  ;;  %v1326_v16 = vld [vmem:[%s1396_s3] ss:$0 sm:$0xff] }
 0x1b3   : > { %v473_v19 = vmul.f32 0.5, %v465_v18  ;;  %v348_v21 = vpop.permute.xlu0 %347 }
 0x1b4   : > { %v384_v20 = vpop.permute.xlu2 %383  ;;  %v419_v34 = vmul.f32 %v348_v21, %v348_v21 }
 0x1b5   : > { %857 = vmatmul.msk.f32.gmra.mxu3 %vm270_vm0, %v473_v19  ;;  %v434_v24 = vmul.f32 %v384_v20, %v384_v20 }
 0x1bb   : > { %v364_v22 = vpop.permute.xlu1 %363  ;;  %v350_v35 = vpop.permute.xlu0 %349 }
 0x1bc   : > { %v402_v25 = vadd.f32 %v364_v22, %v344_v4  ;;  %v426_v26 = vmul.f32 %v364_v22, %v364_v22  ;;  %v388_v27 = vpop.permute.xlu2 %387  ;;  %v420_v47 = vmul.f32 %v350_v35, %v350_v35 }
 0x1bd   : > { %v435_v39 = vmul.f32 %v388_v27, %v388_v27 }
 0x1be   : > { %v410_v28 = vadd.f32 %v402_v25, %v384_v20  ;;  %v442_v29 = vadd.f32 %v426_v26, %v418_v23  ;;  %v591_v26 = vpop.f32.mrf.mxu2 }
 0x1c0   : > { %v450_v30 = vadd.f32 %v442_v29, %v434_v24  ;;  %v458_v31 = vmul.f32 %v410_v28, %v410_v28  ;;  %842 = vmatmul.msk.f32.gmra.mxu1 %vm270_vm0, %v410_v28 }
 0x1c2   : > { %v466_v32 = vadd.f32 %v458_v31, %v450_v30 }
 0x1c3   : > { %v368_v33 = vpop.permute.xlu1 %367  ;;  %v354_v51 = vpop.permute.xlu0 %353 }
 0x1c4   : > { %v403_v36 = vadd.f32 %v368_v33, %v348_v21  ;;  %v427_v37 = vmul.f32 %v368_v33, %v368_v33  ;;  %v474_v38 = vmul.f32 0.5, %v466_v32  ;;  %v390_v42 = vpop.permute.xlu2 %389  ;;  %v421_v60 = vmul.f32 %v354_v51, %v354_v51 }
 0x1c5   : > { %v436_v52 = vmul.f32 %v390_v42, %v390_v42 }
 0x1c6   : > { %v411_v40 = vadd.f32 %v403_v36, %v388_v27  ;;  %v443_v41 = vadd.f32 %v427_v37, %v419_v34  ;;  %858 = vmatmul.msk.f32.gmra.mxu3 %vm270_vm0, %v474_v38  ;;  %v594_v36 = vpop.f32.mrf.mxu2 }
 0x1c8   : > { %v451_v43 = vadd.f32 %v443_v41, %v435_v39  ;;  %v459_v44 = vmul.f32 %v411_v40, %v411_v40  ;;  %843 = vmatmul.msk.f32.gmra.mxu1 %vm270_vm0, %v411_v40 }
 0x1ca   : > { %v467_v45 = vadd.f32 %v459_v44, %v451_v43 }
 0x1cb   : > { %v370_v46 = vpop.permute.xlu1 %369  ;;  %v356_v7 = vpop.permute.xlu0 %355 }
 0x1cc   : > { %v404_v48 = vadd.f32 %v370_v46, %v350_v35  ;;  %v428_v49 = vmul.f32 %v370_v46, %v370_v46  ;;  %v475_v50 = vmul.f32 0.5, %v467_v45  ;;  %v394_v57 = vpop.permute.xlu2 %393  ;;  %v422_v10 = vmul.f32 %v356_v7, %v356_v7 }
 0x1cd   : > { %v437_v0 = vmul.f32 %v394_v57, %v394_v57 }
 0x1ce   : > { %v412_v53 = vadd.f32 %v404_v48, %v390_v42  ;;  %v444_v54 = vadd.f32 %v428_v49, %v420_v47  ;;  %859 = vmatmul.msk.f32.gmra.mxu3 %vm270_vm0, %v475_v50  ;;  %v597_v41 = vpop.f32.mrf.mxu2 }
 0x1d0   : > { %v452_v55 = vadd.f32 %v444_v54, %v436_v52  ;;  %v460_v56 = vmul.f32 %v412_v53, %v412_v53  ;;  %844 = vmatmul.msk.f32.gmra.mxu1 %vm270_vm0, %v412_v53  ;;  %v529_v5 = vpop.f32.mrf.mxu1 }
 0x1d1   : > { %v589_v13 = vadd.f32 %v588_v6, %v529_v5 }
 0x1d2   : > { %v468_v58 = vadd.f32 %v460_v56, %v452_v55 }
 0x1d3   : > { %v374_v59 = vpop.permute.xlu1 %373 }
 0x1d4   : > { %v405_v61 = vadd.f32 %v374_v59, %v354_v51  ;;  %v429_v62 = vmul.f32 %v374_v59, %v374_v59  ;;  %v476_v63 = vmul.f32 0.5, %v468_v58  ;;  %v396_v11 = vpop.permute.xlu2 %395 }
 0x1d5   : > { %v438_v18 = vmul.f32 %v396_v11, %v396_v11 }
 0x1d6   : > { %v413_v1 = vadd.f32 %v405_v61, %v394_v57  ;;  %v445_v2 = vadd.f32 %v429_v62, %v421_v60  ;;  %860 = vmatmul.msk.f32.gmra.mxu3 %vm270_vm0, %v476_v63  ;;  %v600_v44 = vpop.f32.mrf.mxu2 }
 0x1d8   : > { %v453_v8 = vadd.f32 %v445_v2, %v437_v0  ;;  %v461_v3 = vmul.f32 %v413_v1, %v413_v1  ;;  %845 = vmatmul.msk.f32.gmra.mxu1 %vm270_vm0, %v413_v1  ;;  %v532_v25 = vpop.f32.mrf.mxu1 }
 0x1d9   : > { %v592_v29 = vadd.f32 %v591_v26, %v532_v25 }
 0x1da   : > { %v469_v9 = vadd.f32 %v461_v3, %v453_v8 }
 0x1db   : > { %v376_v12 = vpop.permute.xlu1 %375 }
 0x1dc   : > { %v406_v14 = vadd.f32 %v376_v12, %v356_v7  ;;  %v430_v15 = vmul.f32 %v376_v12, %v376_v12  ;;  %v477_v17 = vmul.f32 0.5, %v469_v9 }
 0x1dd   : > { %v658_v4 = vpop.f32.mrf.mxu3 }
 0x1de   : > { %v414_v19 = vadd.f32 %v406_v14, %v396_v11  ;;  %v446_v20 = vadd.f32 %v430_v15, %v422_v10  ;;  %v682_v21 = vadd.f32 %v658_v4, %v589_v13  ;;  %861 = vmatmul.msk.f32.gmra.mxu3 %vm270_vm0, %v477_v17  ;;  %v603_v52 = vpop.f32.mrf.mxu2 }
 0x1e0   : > { %v454_v22 = vadd.f32 %v446_v20, %v438_v18  ;;  %v462_v23 = vmul.f32 %v414_v19, %v414_v19  ;;  %v694_v24 = vadd.f32 %v1326_v16, %v682_v21  ;;  %846 = vmatmul.msk.f32.gmra.mxu1 %vm270_vm0, %v414_v19 }
 0x1e2   : > { %v702_v27 = vmax.f32 %v694_v24, 0.0  ;;  %v470_v28 = vadd.f32 %v462_v23, %v454_v22 }
 0x1e4   : > { %710 = vst.msk [vmem:[%s1333_s30] sm:$0xff] %vm270_vm0, %v702_v27  ;;  %v478_v30 = vmul.f32 0.5, %v470_v28 }
 0x1e5   : > { %v661_v31 = vpop.f32.mrf.mxu3 }
 0x1e6   : > { %v683_v32 = vadd.f32 %v661_v31, %v592_v29  ;;  %862 = vmatmul.msk.f32.gmra.mxu3 %vm270_vm0, %v478_v30  ;;  %v606_v62 = vpop.f32.mrf.mxu2 }
 0x1e8   : > { %v695_v33 = vadd.f32 %v1326_v16, %v683_v32 }
 0x1ea   : > { %v703_v34 = vmax.f32 %v695_v33, 0.0 }
 0x1ec   : > { %711 = vst.msk [vmem:[%s1333_s30 + $0x8] sm:$0xff] %vm270_vm0, %v703_v34 }
 0x1ee   : > { %v609_v8 = vpop.f32.mrf.mxu2 }
 0x22c   : > { %v535_v35 = vpop.f32.mrf.mxu1 }
 0x22d   : > { %v595_v37 = vadd.f32 %v594_v36, %v535_v35 }
 0x238   : > { %v664_v38 = vpop.f32.mrf.mxu3 }
 0x239   : > { %v684_v39 = vadd.f32 %v664_v38, %v595_v37 }
 0x23b   : > { %v696_v40 = vadd.f32 %v1326_v16, %v684_v39 }
 0x23d   : > { %v704_v42 = vmax.f32 %v696_v40, 0.0  ;;  %v538_v43 = vpop.f32.mrf.mxu1 }
 0x23e   : > { %v598_v46 = vadd.f32 %v597_v41, %v538_v43 }
 0x23f   : > { %863 = vst.msk [vmem:[%s1333_s30 + $0x10] sm:$0xff] %vm270_vm0, %v704_v42 }
 0x245   : > { %v541_v45 = vpop.f32.mrf.mxu1 }
 0x246   : > { %v601_v51 = vadd.f32 %v600_v44, %v541_v45 }
 0x249   : > { %v667_v47 = vpop.f32.mrf.mxu3 }
 0x24a   : > { %v685_v48 = vadd.f32 %v667_v47, %v598_v46 }
 0x24c   : > { %v697_v49 = vadd.f32 %v1326_v16, %v685_v48 }
 0x24d   : > { %v544_v53 = vpop.f32.mrf.mxu1 }
 0x24e   : > { %v705_v50 = vmax.f32 %v697_v49, 0.0  ;;  %v604_v58 = vadd.f32 %v603_v52, %v544_v53 }
 0x250   : > { %864 = vst.msk [vmem:[%s1333_s30 + $0x18] sm:$0xff] %vm270_vm0, %v705_v50 }
 0x251   : > { %v670_v54 = vpop.f32.mrf.mxu3 }
 0x252   : > { %v686_v55 = vadd.f32 %v670_v54, %v601_v51 }
 0x254   : > { %v698_v56 = vadd.f32 %v1326_v16, %v686_v55 }
 0x255   : > { %v547_v61 = vpop.f32.mrf.mxu1 }
 0x256   : > { %v706_v57 = vmax.f32 %v698_v56, 0.0  ;;  %v607_v1 = vadd.f32 %v606_v62, %v547_v61 }
 0x258   : > { %865 = vst.msk [vmem:[%s1333_s30 + $0x20] sm:$0xff] %vm270_vm0, %v706_v57 }
 0x259   : > { %v673_v59 = vpop.f32.mrf.mxu3 }
 0x25a   : > { %v687_v60 = vadd.f32 %v673_v59, %v604_v58 }
 0x25c   : > { %v699_v63 = vadd.f32 %v1326_v16, %v687_v60 }
 0x25d   : > { %v550_v7 = vpop.f32.mrf.mxu1 }
 0x25e   : > { %v707_v0 = vmax.f32 %v699_v63, 0.0  ;;  %v610_v9 = vadd.f32 %v609_v8, %v550_v7 }
 0x260   : > { %866 = vst.msk [vmem:[%s1333_s30 + $0x28] sm:$0xff] %vm270_vm0, %v707_v0 }
 0x261   : > { %v676_v2 = vpop.f32.mrf.mxu3 }
 0x262   : > { %v688_v5 = vadd.f32 %v676_v2, %v607_v1 }
 0x264   : > { %v700_v6 = vadd.f32 %v1326_v16, %v688_v5 }
 0x266   : > { %v708_v3 = vmax.f32 %v700_v6, 0.0 }
 0x268   : > { %867 = vst.msk [vmem:[%s1333_s30 + $0x30] sm:$0xff] %vm270_vm0, %v708_v3 }
 0x269   : > { %v679_v10 = vpop.f32.mrf.mxu3 }
 0x26a   : > { %v689_v11 = vadd.f32 %v679_v10, %v610_v9 }
 0x26c   : > { %v701_v12 = vadd.f32 %v1326_v16, %v689_v11 }
 0x26e   : > { %v709_v13 = vmax.f32 %v701_v12, 0.0 }
 0x270   : > { %868 = vst.msk [vmem:[%s1333_s30 + $0x38] sm:$0xff] %vm270_vm0, %v709_v13 }
 0x271   : > { %1046 = shalt.err (!%p1043_p10)
}
 0x272   : > { %s1097_s10 = smov 128   ;;  %s1098_s21 = smov 8  }
 0x273   : > { %885 = dma.vmem_to_hbm [thread:$0]  (%p1193_p3), %s736_s27, 1024, %s738_s28, %s722_s19, %s1097_s10, %s1097_s10, %s1098_s21  }
 0x274 PF: > { %s752_s26 = sand.u32 1, %s1077_s15   ;;  %p1403_p12 = scmp.ge.s32.totalorder %s1089_s18, 2 }
 0x275   : > { %s753_s30 = scalar_lea.sflag [#allocation4], %s752_s26 }
 0x276   : > { %p896_p13 = pnand %p1403_p12, %p1159_p6 }
 0x278   : > { %p897_p0 = pneg %p896_p13 }
 0x27a   : > { %1072 = dma.done.wait (%p897_p0), %s753_s30, 1024  }
 0x27b   : > { %1074 = vsyncadd (%p897_p0), %s753_s30, 4294966272  ;;  %p18_p5 = scmp.ge.s32.totalorder %s1177_s29, 4   ;;  %s1404_s15 = smov %s1081_s16 }
 0x27c   : > { %s1405_s16 = smov %s1085_s17  ;;  %s1406_s17 = smov %s1189_s8 }
 0x27d   : > { %s1407_s18 = smov %s1177_s29  ;;  %20 = sbr.rel (!%p18_p5) target bundleno = 6 (0x6), region = 90 }
 0x282   :  { %759 = vsyncpa [#allocation3], 1 }
 0x283   :  { %761 = vsyncpa [#allocation3 + $0x1], 1 }
 0x284   :  { %762 = vsyncpa [#allocation6], 1 }
 0x285   :  { %763 = vsyncpa [#allocation4], 1 }
 0x286   :  { %765 = vsyncpa [#allocation4 + $0x1], 1 }

</bundles_post_ra>
